<compile_context>
chip_gen: v7x
topology: tpu7x:2x2x1
jax: 0.10.0
libtpu: 0.0.40
codegen_flags: <defaults>
</compile_context>

<pallas_src>
import jax
import jax.numpy as jnp
from jax.experimental import pallas as pl
from jax.experimental.pallas import tpu as pltpu


# ----------------------------- small helpers --------------------------------
def _cdiv(a, b):
    return (a + b - 1) // b


def _round_up(x, m):
    return ((x + m - 1) // m) * m


def _sublane(dtype):
    # native sublane packing: 8 for 4-byte, 16 for 2-byte, 32 for 1-byte dtypes
    return {4: 8, 2: 16, 1: 32}.get(jnp.dtype(dtype).itemsize, 8)


def _pick_tile(dim, cap, mult):
    """Tile that divides round_up(dim, tile) with minimal padding waste."""
    dim = max(int(dim), 1)
    if dim <= cap:
        return _round_up(dim, mult)
    n_tiles = _cdiv(dim, cap)
    return _round_up(_cdiv(dim, n_tiles), mult)


def _split_tile(t, total, mult):
    """Halve a tile (keeping total % t == 0) to expose >=2 parallel grid tiles."""
    half = _round_up(t // 2, mult)
    if mult <= half < t and total % half == 0:
        return half
    return t


def _vmem_cap_bytes():
    phys = 64 << 20  # conservative default = v7x physical VMEM
    try:
        info = pltpu.get_tpu_info()
        phys = int(getattr(info, "vmem_capacity_bytes", phys))
    except Exception:
        pass
    return int(min(phys // 2, 40 << 20))


# ----------------------------- kernels --------------------------------------
def _make_linear_kernel(has_bias, direct_acc):
    """y = x @ w (+ b).  Grid = (M tiles, N tiles, K tiles), K innermost."""

    def kernel(*refs):
        if has_bias:
            if direct_acc:
                x_ref, w_ref, b_ref, o_ref = refs
                acc_ref = o_ref
            else:
                x_ref, w_ref, b_ref, o_ref, acc_ref = refs
        else:
            b_ref = None
            if direct_acc:
                x_ref, w_ref, o_ref = refs
                acc_ref = o_ref
            else:
                x_ref, w_ref, o_ref, acc_ref = refs

        k = pl.program_id(2)

        @pl.when(k == 0)
        def _():
            acc_ref[...] = jnp.zeros_like(acc_ref)

        acc_ref[...] += jnp.dot(
            x_ref[...], w_ref[...], preferred_element_type=jnp.float32
        )

        if has_bias or not direct_acc:
            @pl.when(k == pl.num_programs(2) - 1)
            def _():
                r = acc_ref[...]
                if has_bias:
                    r = r + b_ref[...].astype(jnp.float32)
                o_ref[...] = r.astype(o_ref.dtype)

    return kernel


def _make_linear_bn_kernel(x_resident, direct_acc, eps, batch, tk):
    """Fused y = BatchNorm1d(x @ w) (training-mode, biased variance).

    Grid = (N tiles, K tiles).  The full (padded) batch lives in each output
    tile so per-feature batch statistics are exact.  Padded rows are masked
    out of the statistics with an iota row mask.
    """

    def kernel(*refs):
        if direct_acc:
            x_ref, w_ref, g_ref, beta_ref, o_ref = refs
            acc_ref = o_ref
        else:
            x_ref, w_ref, g_ref, beta_ref, o_ref, acc_ref = refs

        k = pl.program_id(1)

        @pl.when(k == 0)
        def _():
            acc_ref[...] = jnp.zeros_like(acc_ref)

        if x_resident:
            # x is (Mp, Kp) resident in VMEM; take the k-th K chunk.
            start = pl.multiple_of(k * tk, 128)
            x_blk = x_ref[:, pl.ds(start, tk)]
        else:
            x_blk = x_ref[...]

        acc_ref[...] += jnp.dot(
            x_blk, w_ref[...], preferred_element_type=jnp.float32
        )

        @pl.when(k == pl.num_programs(1) - 1)
        def _():
            h = acc_ref[...].astype(jnp.float32)
            # Mask padded batch rows out of the statistics (robust + stable).
            row = jax.lax.broadcasted_iota(jnp.int32, h.shape, 0)
            mask = (row < batch).astype(jnp.float32)
            mean = jnp.sum(h * mask, axis=0, keepdims=True) / batch
            d = (h - mean) * mask
            var = jnp.sum(d * d, axis=0, keepdims=True) / batch  # >= 0 by construction
            inv_std = jax.lax.rsqrt(var + eps)
            o_ref[...] = (
                (h - mean) * inv_std * g_ref[...].astype(jnp.float32)
                + beta_ref[...].astype(jnp.float32)
            ).astype(o_ref.dtype)

    return kernel


# ----------------------------- wrappers --------------------------------------
def linear_pallas(x, w, b=None, *, out_features=None, compute_dtype=None,
                  tm_max=512, tn_max=512, tk_max=1024):
    """x: (B, K), w: (Kp, Np) possibly pre-padded, b: (1, Np) or None -> (B, N)."""
    M, K = x.shape
    Kw, Nw = w.shape
    assert K <= Kw, (K, Kw)
    N = int(out_features) if out_features is not None else Nw
    out_dtype = x.dtype
    compute_dtype = jnp.dtype(compute_dtype) if compute_dtype is not None else jnp.dtype(w.dtype)
    c_item = compute_dtype.itemsize
    o_item = jnp.dtype(out_dtype).itemsize
    sub = _sublane(compute_dtype)

    # Tiles: lane dims multiples of 128, sublane dim multiple of dtype packing.
    tk = _pick_tile(Kw, tk_max, 128)
    tn = _pick_tile(Nw, tn_max, 128)
    tm = _pick_tile(M, tm_max, sub)
    Kp, Np, Mp = _round_up(Kw, tk), _round_up(Nw, tn), _round_up(M, tm)

    # v7x megacore: prefer >=2 tiles along a parallel axis when it costs nothing.
    if (Mp // tm) * (Np // tn) < 2:
        tn = _split_tile(tn, Np, 128)
    if (Mp // tm) * (Np // tn) < 2:
        tm = _split_tile(tm, Mp, sub)

    # Per-call padding of x only; w is expected pre-padded (pad here is a no-op then).
    xp = x
    if (Mp, Kp) != (M, K):
        xp = jnp.pad(x, ((0, Mp - M), (0, Kp - K)))
    if xp.dtype != compute_dtype:
        xp = xp.astype(compute_dtype)
    wp = w
    if (Kp, Np) != (Kw, Nw):
        wp = jnp.pad(w, ((0, Kp - Kw), (0, Np - Nw)))
    if wp.dtype != compute_dtype:
        wp = wp.astype(compute_dtype)

    has_bias = b is not None
    direct_acc = out_dtype == jnp.float32  # accumulate straight into the output block

    in_specs = [
        pl.BlockSpec((tm, tk), lambda i, j, k: (i, k)),
        pl.BlockSpec((tk, tn), lambda i, j, k: (k, j)),
    ]
    args = [xp, wp]
    if has_bias:
        bp = b
        if bp.shape[1] != Np:
            bp = jnp.pad(bp, ((0, 0), (0, Np - bp.shape[1])))
        bp = bp.astype(jnp.float32)
        in_specs.append(pl.BlockSpec((1, tn), lambda i, j, k: (0, j)))
        args.append(bp)

    grid = (Mp // tm, Np // tn, Kp // tk)
    scratch = [] if direct_acc else [pltpu.VMEM((tm, tn), jnp.float32)]

    vmem_bytes = (
        2 * c_item * (tm * tk + tk * tn)           # double-buffered input tiles
        + 2 * o_item * tm * tn                     # output tile
        + (0 if direct_acc else 4 * tm * tn)       # f32 accumulator
        + (2 * 4 * tn if has_bias else 0)
        + (2 << 20)                                # slack
    )
    cost = pl.CostEstimate(
        flops=2 * M * Kp * N,
        transcendentals=0,
        bytes_accessed=c_item * (Mp * Kp * (Np // tn) + Kp * Np * (Mp // tm))
        + o_item * Mp * Np,
    )

    out = pl.pallas_call(
        _make_linear_kernel(has_bias, direct_acc),
        out_shape=jax.ShapeDtypeStruct((Mp, Np), out_dtype),
        grid_spec=pltpu.PrefetchScalarGridSpec(
            num_scalar_prefetch=0,
            grid=grid,
            in_specs=in_specs,
            out_specs=pl.BlockSpec((tm, tn), lambda i, j, k: (i, j)),
            scratch_shapes=scratch,
        ),
        compiler_params=pltpu.CompilerParams(
            dimension_semantics=("parallel", "parallel", "arbitrary"),
            vmem_limit_bytes=int(min(max(vmem_bytes, 8 << 20), _vmem_cap_bytes())),
        ),
        cost_estimate=cost,
    )(*args)

    if (Mp, Np) != (M, N):
        out = out[:M, :N]
    return out


def linear_bn_pallas(x, w, gamma, beta, *, out_features=None, eps=1e-5,
                     compute_dtype=None, tn_max=512, tk_max=1024):
    """Fused (x @ w) + training-mode BatchNorm1d over the batch axis."""
    M, K = x.shape
    Kw, Nw = w.shape
    assert K <= Kw, (K, Kw)
    N = int(out_features) if out_features is not None else Nw
    out_dtype = x.dtype
    compute_dtype = jnp.dtype(compute_dtype) if compute_dtype is not None else jnp.dtype(w.dtype)
    c_item = compute_dtype.itemsize
    o_item = jnp.dtype(out_dtype).itemsize
    sub = _sublane(compute_dtype)

    tk = _pick_tile(Kw, tk_max, 128)
    tn = _pick_tile(Nw, tn_max, 128)
    Kp, Np = _round_up(Kw, tk), _round_up(Nw, tn)
    Mp = _round_up(M, sub)  # full (padded) batch resident per N tile

    # v7x megacore: try to give both TensorCores an N tile.
    if Np // tn < 2:
        tn = _split_tile(tn, Np, 128)

    direct_acc = out_dtype == jnp.float32
    vmem_cap = _vmem_cap_bytes()
    fixed_bytes = (
        2 * c_item * tk * tn
        + 2 * o_item * Mp * tn
        + (0 if direct_acc else 4 * Mp * tn)
        + 4 * 4 * tn
        + (2 << 20)
    )
    # Keep x fully resident (single HBM read) when it fits next to everything else.
    x_resident = (2 * c_item * Mp * Kp + fixed_bytes) <= vmem_cap
    # TODO(synk): for batches too large to keep even an (Mp, tn) accumulator in
    # VMEM, fall back to a two-pass (stats pass + normalize pass) structure.

    xp = x
    if (Mp, Kp) != (M, K):
        xp = jnp.pad(x, ((0, Mp - M), (0, Kp - K)))
    if xp.dtype != compute_dtype:
        xp = xp.astype(compute_dtype)
    wp = w
    if (Kp, Np) != (Kw, Nw):
        wp = jnp.pad(w, ((0, Kp - Kw), (0, Np - Nw)))
    if wp.dtype != compute_dtype:
        wp = wp.astype(compute_dtype)
    gp = gamma if gamma.shape[1] == Np else jnp.pad(gamma, ((0, 0), (0, Np - gamma.shape[1])))
    bp = beta if beta.shape[1] == Np else jnp.pad(beta, ((0, 0), (0, Np - beta.shape[1])))
    gp = gp.astype(jnp.float32)
    bp = bp.astype(jnp.float32)

    if x_resident:
        x_spec = pl.BlockSpec((Mp, Kp), lambda j, k: (0, 0))   # one DMA, then resident
        x_bytes = c_item * Mp * Kp
        x_vmem = 2 * c_item * Mp * Kp
    else:
        x_spec = pl.BlockSpec((Mp, tk), lambda j, k: (0, k))   # streamed (re-read per N tile)
        x_bytes = c_item * Mp * Kp * (Np // tn)
        x_vmem = 2 * c_item * Mp * tk

    grid = (Np // tn, Kp // tk)
    scratch = [] if direct_acc else [pltpu.VMEM((Mp, tn), jnp.float32)]
    vmem_bytes = x_vmem + fixed_bytes
    cost = pl.CostEstimate(
        flops=2 * M * Kp * N + 8 * M * N,
        transcendentals=N,  # rsqrt per feature
        bytes_accessed=x_bytes + c_item * Kp * Np + o_item * Mp * Np + 2 * 4 * Np,
    )

    out = pl.pallas_call(
        _make_linear_bn_kernel(x_resident, direct_acc, eps, M, tk),
        out_shape=jax.ShapeDtypeStruct((Mp, Np), out_dtype),
        grid_spec=pltpu.PrefetchScalarGridSpec(
            num_scalar_prefetch=0,
            grid=grid,
            in_specs=[
                x_spec,
                pl.BlockSpec((tk, tn), lambda j, k: (k, j)),
                pl.BlockSpec((1, tn), lambda j, k: (0, j)),
                pl.BlockSpec((1, tn), lambda j, k: (0, j)),
            ],
            out_specs=pl.BlockSpec((Mp, tn), lambda j, k: (0, j)),
            scratch_shapes=scratch,
        ),
        compiler_params=pltpu.CompilerParams(
            dimension_semantics=("parallel", "arbitrary"),
            vmem_limit_bytes=int(min(max(vmem_bytes, 8 << 20), vmem_cap)),
        ),
        cost_estimate=cost,
    )(xp, wp, gp, bp)

    if (Mp, Np) != (M, N):
        out = out[:M, :N]
    return out


class LinearLayerPallas:
    """Mirrors the PyTorch LinearLayer module (forward pass)."""

    def __init__(self, in_features, out_features, use_bias=True, use_bn=False, *,
                 key, compute_dtype=jnp.float32, tn_max=512, tk_max=1024):
        self.in_features = in_features
        self.out_features = out_features
        self.use_bias = use_bias
        self.use_bn = use_bn
        self.compute_dtype = jnp.dtype(compute_dtype)
        self.tn_max, self.tk_max = tn_max, tk_max

        # Pick N/K tiles once and pre-pad + pre-cast the weight (no per-call pad).
        tn = _pick_tile(out_features, tn_max, 128)
        tk = _pick_tile(in_features, tk_max, 128)
        Np, Kp = _round_up(out_features, tn), _round_up(in_features, tk)

        k_w, k_b = jax.random.split(key)
        bound = 1.0 / (in_features ** 0.5)  # PyTorch nn.Linear default init range
        # stored transposed relative to PyTorch's (out, in) weight
        w = jax.random.uniform(k_w, (in_features, out_features), jnp.float32, -bound, bound)
        self._w_true = w
        self.w = jnp.pad(
            w, ((0, Kp - in_features), (0, Np - out_features))
        ).astype(self.compute_dtype)

        has_linear_bias = self.use_bias and (not self.use_bn)
        if has_linear_bias:
            b = jax.random.uniform(k_b, (1, out_features), jnp.float32, -bound, bound)
            self._b_true = b
            self.b = jnp.pad(b, ((0, 0), (0, Np - out_features)))  # keep f32
        else:
            self._b_true = None
            self.b = None
        if self.use_bn:
            self.gamma = jnp.ones((1, Np), jnp.float32)
            self.beta = jnp.zeros((1, Np), jnp.float32)
            # TODO(synk): BatchNorm1d running_mean/running_var tracking (module state)
            # is not implemented; this is the training-mode normalization forward only.

    def __call__(self, x):
        if self.use_bn:
            return linear_bn_pallas(
                x, self.w, self.gamma, self.beta,
                out_features=self.out_features, compute_dtype=self.compute_dtype,
                tn_max=self.tn_max, tk_max=self.tk_max)
        return linear_pallas(
            x, self.w, self.b,
            out_features=self.out_features, compute_dtype=self.compute_dtype,
            tn_max=self.tn_max, tk_max=self.tk_max)


# ------------------------------ demo -----------------------------------------
if __name__ == "__main__":
    key = jax.random.PRNGKey(0)
    k_x, k_x2, k_p1, k_p2, k_p3, k_p4, k_p5 = jax.random.split(key, 7)

    # --- Small shapes consistent with the module (bias path + BN path) -------
    batch, in_features, out_features = 8, 32, 16
    x = jax.random.normal(k_x, (batch, in_features), jnp.float32)

    layer = LinearLayerPallas(in_features, out_features, use_bias=True, use_bn=False, key=k_p1)
    y = jax.block_until_ready(layer(x))
    y_ref = x @ layer._w_true + layer._b_true
    assert jnp.allclose(y, y_ref, atol=1e-4, rtol=1e-4)

    layer_bn = LinearLayerPallas(in_features, out_features, use_bias=True, use_bn=True, key=k_p2)
    y_bn = jax.block_until_ready(layer_bn(x))
    h = x @ layer_bn._w_true
    mu = h.mean(0, keepdims=True)
    var = ((h - mu) ** 2).mean(0, keepdims=True)
    y_bn_ref = (h - mu) / jnp.sqrt(var + 1e-5)
    assert jnp.allclose(y_bn, y_bn_ref, atol=1e-3, rtol=1e-3)

    # --- Larger shapes to exercise K-accumulation (tk_max=256 -> 3 K steps) ---
    batch2, in2, out2 = 16, 640, 256
    x2 = jax.random.normal(k_x2, (batch2, in2), jnp.float32)

    layer2 = LinearLayerPallas(in2, out2, use_bias=True, use_bn=False, key=k_p3, tk_max=256)
    y2 = jax.block_until_ready(layer2(x2))
    y2_ref = x2 @ layer2._w_true + layer2._b_true
    assert jnp.allclose(y2, y2_ref, atol=1e-3, rtol=1e-3)

    layer2_bn = LinearLayerPallas(in2, out2, use_bias=True, use_bn=True, key=k_p4, tk_max=256)
    y2_bn = jax.block_until_ready(layer2_bn(x2))
    h2 = x2 @ layer2_bn._w_true
    mu2 = h2.mean(0, keepdims=True)
    var2 = ((h2 - mu2) ** 2).mean(0, keepdims=True)
    y2_bn_ref = (h2 - mu2) / jnp.sqrt(var2 + 1e-5)
    assert jnp.allclose(y2_bn, y2_bn_ref, atol=1e-3, rtol=1e-3)

    # --- bf16 compute path (operands cast to bf16, f32 accumulation) ---------
    layer3 = LinearLayerPallas(in2, out2, use_bias=True, use_bn=False, key=k_p5,
                               compute_dtype=jnp.bfloat16, tk_max=256)
    y3 = jax.block_until_ready(layer3(x2))
    y3_ref = jnp.dot(x2.astype(jnp.bfloat16), layer3._w_true.astype(jnp.bfloat16),
                     preferred_element_type=jnp.float32) + layer3._b_true
    assert jnp.allclose(y3, y3_ref, atol=2e-2, rtol=2e-2)

    print("KERNEL_OK")
</pallas_src>

<mosaic_0001>
module attributes {stable_mosaic.version = 11 : i64} {
  func.func @kernel(%arg0: i32, %arg1: i32, %arg2: i32, %arg3: memref<8x128xf32, #tpu.memory_space<vmem>>, %arg4: memref<128x128xf32, #tpu.memory_space<vmem>>, %arg5: memref<1x128xf32, #tpu.memory_space<vmem>>, %arg6: memref<8x128xf32, #tpu.memory_space<vmem>>) attributes {dimension_semantics = [#tpu.dimension_semantics<parallel>, #tpu.dimension_semantics<parallel>, #tpu.dimension_semantics<arbitrary>], iteration_bounds = array<i64: 1, 1, 1>, scalar_prefetch = 0 : i64, scratch_operands = 0 : i64, tpu.core_type = #tpu.core_type<tc>, window_params = [{transform_indices = @transform_0, window_bounds = array<i64: 8, 128>}, {transform_indices = @transform_1, window_bounds = array<i64: 128, 128>}, {transform_indices = @transform_2, window_bounds = array<i64: 1, 128>}, {transform_indices = @transform_3, window_bounds = array<i64: 8, 128>}]} {
    %c0_i32 = arith.constant 0 : i32
    %0 = arith.cmpi eq, %arg2, %c0_i32 : i32
    %1 = arith.extui %0 : i1 to i32
    %c0_i32_0 = arith.constant 0 : i32
    %2 = arith.cmpi ne, %1, %c0_i32_0 : i32
    scf.if %2 {
      %cst_10 = arith.constant 0.000000e+00 : f32
      %12 = vector.broadcast %cst_10 : f32 to vector<8x128xf32>
      %c0_11 = arith.constant 0 : index
      %c0_12 = arith.constant 0 : index
      %13 = vector.load %arg6[%c0_11, %c0_12] : memref<8x128xf32, #tpu.memory_space<vmem>>, vector<8x128xf32>
      tpu.vector_store %arg6[%c0_11, %c0_12], %12 {strides = array<i32>} : memref<8x128xf32, #tpu.memory_space<vmem>>, vector<8x128xf32>,
    } else {
    }
    %c0 = arith.constant 0 : index
    %c0_1 = arith.constant 0 : index
    %3 = vector.load %arg6[%c0, %c0_1] : memref<8x128xf32, #tpu.memory_space<vmem>>, vector<8x128xf32>
    %c0_2 = arith.constant 0 : index
    %c0_3 = arith.constant 0 : index
    %4 = vector.load %arg3[%c0_2, %c0_3] : memref<8x128xf32, #tpu.memory_space<vmem>>, vector<8x128xf32>
    %c0_4 = arith.constant 0 : index
    %c0_5 = arith.constant 0 : index
    %5 = vector.load %arg4[%c0_4, %c0_5] : memref<128x128xf32, #tpu.memory_space<vmem>>, vector<128x128xf32>
    %cst = arith.constant dense<0.000000e+00> : vector<8x128xf32>
    %6 = tpu.matmul %4, %5, %cst {dimension_numbers = #tpu.dot_dimension_numbers<[1], [0], [0], [1], [0, 0, 1, 1], [], []>} : vector<8x128xf32>, vector<128x128xf32>, vector<8x128xf32> -> vector<8x128xf32>
    %7 = arith.addf %3, %6 : vector<8x128xf32>
    %c0_6 = arith.constant 0 : index
    %c0_7 = arith.constant 0 : index
    %8 = vector.load %arg6[%c0_6, %c0_7] : memref<8x128xf32, #tpu.memory_space<vmem>>, vector<8x128xf32>
    tpu.vector_store %arg6[%c0_6, %c0_7], %7 {strides = array<i32>} : memref<8x128xf32, #tpu.memory_space<vmem>>, vector<8x128xf32>,
    %c0_i32_8 = arith.constant 0 : i32
    %9 = arith.cmpi eq, %arg2, %c0_i32_8 : i32
    %10 = arith.extui %9 : i1 to i32
    %c0_i32_9 = arith.constant 0 : i32
    %11 = arith.cmpi ne, %10, %c0_i32_9 : i32
    scf.if %11 {
      %c0_10 = arith.constant 0 : index
      %c0_11 = arith.constant 0 : index
      %12 = vector.load %arg6[%c0_10, %c0_11] : memref<8x128xf32, #tpu.memory_space<vmem>>, vector<8x128xf32>
      %c0_12 = arith.constant 0 : index
      %c0_13 = arith.constant 0 : index
      %13 = vector.load %arg5[%c0_12, %c0_13] : memref<1x128xf32, #tpu.memory_space<vmem>>, vector<1x128xf32>
      %14 = vector.broadcast %13 : vector<1x128xf32> to vector<8x128xf32>
      %15 = arith.addf %12, %14 : vector<8x128xf32>
      %c0_14 = arith.constant 0 : index
      %c0_15 = arith.constant 0 : index
      %16 = vector.load %arg6[%c0_14, %c0_15] : memref<8x128xf32, #tpu.memory_space<vmem>>, vector<8x128xf32>
      tpu.vector_store %arg6[%c0_14, %c0_15], %15 {strides = array<i32>} : memref<8x128xf32, #tpu.memory_space<vmem>>, vector<8x128xf32>,
    } else {
    }
    return
  }
  func.func @transform_0(%arg0: i32, %arg1: i32, %arg2: i32) -> (i32, i32) {
    %c0_i32 = arith.constant 0 : i32
    return %arg0, %arg2 : i32, i32
  }
  func.func @transform_1(%arg0: i32, %arg1: i32, %arg2: i32) -> (i32, i32) {
    %c0_i32 = arith.constant 0 : i32
    return %arg2, %arg1 : i32, i32
  }
  func.func @transform_2(%arg0: i32, %arg1: i32, %arg2: i32) -> (i32, i32) {
    %c0_i32 = arith.constant 0 : i32
    %c0_i32_0 = arith.constant 0 : i32
    return %c0_i32, %arg1 : i32, i32
  }
  func.func @transform_3(%arg0: i32, %arg1: i32, %arg2: i32) -> (i32, i32) {
    %c0_i32 = arith.constant 0 : i32
    return %arg0, %arg1 : i32, i32
  }
}

</mosaic_0001>

<bundles_post_ra>
// kernel: tpu_custom_call.1
= control target key start
LH: loop header
LB: loop body
LE: loop exit
PB: predicated region body
PF: predicated region fallthrough
CT: control target
= control target key end

     0   :  { %8 = vsyncpa [#allocation3], 0  ;;  %s396_s0 = inlined_call_operand.hbm [shape: f32[8,128], index: 0, kind: input, shape index: {}]   ;;  %s397_s1 = inlined_call_operand.hbm [shape: f32[128,128], index: 1, kind: input, shape index: {}]   ;;  %s398_s2 = inlined_call_operand.vmem [shape: f32[1,128], index: 2, kind: input, shape index: {}]   ;;  %s399_s3 = inlined_call_operand.hbm [shape: f32[8,128], index: 3, kind: output, shape index: {}]  }
   0x1   :  { %9 = vsyncpa [#allocation6], 0 }
   0x2   :  { %10 = vsyncpa [#allocation4], 0  ;;  %s322_s12 = smov [#allocation2]   ;;  %s323_s14 = smov [#allocation5]  }
   0x3   :  { %s17_s13 = sshll.u32 %s322_s12, 4  ;;  %s26_s15 = sshll.u32 %s323_s14, 4  ;;  %s18_s13 = int_to_ptr.vmem [resolvable:$true] %s17_s13  ;;  %s350_s15 = int_to_ptr.vmem [resolvable:$true] %s26_s15 }
   0x4   :  { %s250_s18 = scalar_lea.hbm %s396_s0, 128 }
   0x5   :  { %p251_p0 = scmp.ne.s32.totalorder %s396_s0, %s250_s18  ;;  %p254_p1 = scmp.lt.u32.totalorder %s250_s18, %s396_s0 }
   0x7   :  { %p256_p2 = pnand %p254_p1, %p251_p0 }
   0x9   :  { %259 = shalt.err (!%p256_p2)
}
   0xa   :  { %s260_s23 = scalar_lea.vmem %s18_s13, 128  ;;  %p265_p4 = scmp.lt.s32.totalorder %s18_s13, %s18_s13 }
   0xb   :  { %p261_p3 = scmp.ne.s32.totalorder %s18_s13, %s260_s23  ;;  %p266_p5 = scmp.lt.s32.totalorder %s260_s23, %s260_s23 }
   0xd   :  { %p267_p6 = por %p266_p5, %p265_p4 }
   0xf   :  { %p268_p7 = pnand %p267_p6, %p261_p3 }
  0x11   :  { %271 = shalt.err (!%p268_p7)
}
  0x12   :  { %20 = dma.hbm_to_vmem [thread:$0]  %s396_s0, 128, %s18_s13, [#allocation3]  }
  0x13   :  { %s272_s28 = scalar_lea.hbm %s397_s1, 2048 }
  0x14   :  { %p273_p8 = scmp.ne.s32.totalorder %s397_s1, %s272_s28  ;;  %p276_p9 = scmp.lt.u32.totalorder %s272_s28, %s397_s1 }
  0x16   :  { %p278_p10 = pnand %p276_p9, %p273_p8 }
  0x18   :  { %281 = shalt.err (!%p278_p10)
}
  0x19   :  { %s282_s6 = scalar_lea.vmem %s350_s15, 2048  ;;  %p287_p12 = scmp.lt.s32.totalorder %s350_s15, %s350_s15 }
  0x1a   :  { %p283_p11 = scmp.ne.s32.totalorder %s350_s15, %s282_s6  ;;  %p288_p13 = scmp.lt.s32.totalorder %s282_s6, %s282_s6 }
  0x1c   :  { %p289_p0 = por %p288_p13, %p287_p12 }
  0x1e   :  { %p290_p1 = pnand %p289_p0, %p283_p11 }
  0x20   :  { %293 = shalt.err (!%p290_p1)
}
  0x21   :  { %s324_s0 = smov 128   ;;  %s325_s7 = smov 8  }
  0x22   :  { %32 = dma.hbm_to_vmem [thread:$0]  %s397_s1, 2048, %s350_s15, [#allocation6], %s324_s0, %s324_s0, %s325_s7  }
  0x23   :  { %316 = dma.done.wait [#allocation3], 128  }
  0x24   :  { %317 = vsyncadd [#allocation3], 4294967168 }
  0x25   :  { %318 = dma.done.wait [#allocation6], 2048  }
  0x26   :  { %319 = vsyncadd [#allocation6], 4294965248  ;;  %v326_v0 = vmov 0.0|0.0   ;;  %vm327_vm0 = vmmov 0   ;;  %v328_v1 = vmov 0.0   ;;  %v48_v2 = vld [vmem:[#allocation5] sm:$0xff] }
  0x27   :  { %218 = vmatprep.subr.bf16.mxu0 %v326_v0  ;;  %215 = vmatprep.mubr.msk.f32.mxu0 %vm327_vm0, %v328_v1  ;;  %v49_v3 = vld [vmem:[#allocation5 + $0x8] sm:$0xff]  ;;  %v50_v4 = vld [vmem:[#allocation5 + $0x10] sm:$0xff]  ;;  %v51_v6 = vld [vmem:[#allocation5 + $0x18] sm:$0xff]  ;;  %s329_s11 = smov [#allocation7]  }
  0x28   :  { %v219_v5 = vpack.c.bf16 %v49_v3, %v48_v2  ;;  %v222_v7 = vpack.c.bf16 %v51_v6, %v50_v4  ;;  %v52_v8 = vld [vmem:[#allocation5 + $0x20] sm:$0xff]  ;;  %v53_v9 = vld [vmem:[#allocation5 + $0x28] sm:$0xff]  ;;  %v54_v11 = vld [vmem:[#allocation5 + $0x30] sm:$0xff]  ;;  %s155_s12 = sshll.u32 %s329_s11, 4  ;;  %s156_s12 = int_to_ptr.vmem [resolvable:$true] %s155_s12 }
  0x29   :  { %v225_v10 = vpack.c.bf16 %v53_v9, %v52_v8  ;;  %v55_v12 = vld [vmem:[#allocation5 + $0x38] sm:$0xff]  ;;  %v56_v14 = vld [vmem:[#allocation5 + $0x40] sm:$0xff]  ;;  %v57_v15 = vld [vmem:[#allocation5 + $0x48] sm:$0xff]  ;;  %s294_s13 = scalar_lea.vmem %s156_s12, 128  ;;  %p299_p3 = scmp.lt.s32.totalorder %s156_s12, %s156_s12 }
  0x2a   :  { %220 = vmatpush3.bf16.msra.mxu0 %v219_v5  ;;  %v228_v13 = vpack.c.bf16 %v55_v12, %v54_v11  ;;  %v231_v16 = vpack.c.bf16 %v57_v15, %v56_v14  ;;  %v58_v17 = vld [vmem:[#allocation5 + $0x50] sm:$0xff]  ;;  %v59_v18 = vld [vmem:[#allocation5 + $0x58] sm:$0xff]  ;;  %v60_v20 = vld [vmem:[#allocation5 + $0x60] sm:$0xff]  ;;  %p295_p2 = scmp.ne.s32.totalorder %s156_s12, %s294_s13  ;;  %p300_p4 = scmp.lt.s32.totalorder %s294_s13, %s294_s13 }
  0x2b   :  { %221 = vmatprep.subr.bf16.mxu0 %v326_v0  ;;  %v234_v19 = vpack.c.bf16 %v59_v18, %v58_v17  ;;  %v61_v21 = vld [vmem:[#allocation5 + $0x68] sm:$0xff]  ;;  %v62_v23 = vld [vmem:[#allocation5 + $0x70] sm:$0xff]  ;;  %v63_v24 = vld [vmem:[#allocation5 + $0x78] sm:$0xff] }
  0x2c   :  { %v237_v22 = vpack.c.bf16 %v61_v21, %v60_v20  ;;  %v240_v25 = vpack.c.bf16 %v63_v24, %v62_v23  ;;  %v47_v26 = vld [vmem:[#allocation2] sm:$0xff]  ;;  %p301_p5 = por %p300_p4, %p299_p3 }
  0x2d   :  { %v165_v28 = vld [vmem:[%s398_s2] ss:$0 sm:$0xff] }
  0x2e   :  { %223 = vmatpush3.bf16.msra.mxu0 %v222_v7  ;;  %p302_p6 = pnand %p301_p5, %p295_p2 }
  0x2f   :  { %224 = vmatprep.subr.bf16.mxu0 %v326_v0 }
  0x32   :  { %226 = vmatpush3.bf16.msra.mxu0 %v225_v10 }
  0x33   :  { %227 = vmatprep.subr.bf16.mxu0 %v326_v0 }
  0x36   :  { %229 = vmatpush3.bf16.msra.mxu0 %v228_v13 }
  0x37   :  { %230 = vmatprep.subr.bf16.mxu0 %v326_v0 }
  0x3a   :  { %232 = vmatpush3.bf16.msra.mxu0 %v231_v16 }
  0x3b   :  { %233 = vmatprep.subr.bf16.mxu0 %v326_v0 }
  0x3e   :  { %235 = vmatpush3.bf16.msra.mxu0 %v234_v19 }
  0x3f   :  { %236 = vmatprep.subr.bf16.mxu0 %v326_v0 }
  0x42   :  { %238 = vmatpush3.bf16.msra.mxu0 %v237_v22 }
  0x43   :  { %239 = vmatprep.subr.bf16.mxu0 %v326_v0 }
  0x46   :  { %241 = vmatpush3.bf16.msra.mxu0 %v240_v25 }
  0x49   :  { %216 = vmatmul.mubr.f32.vlgmr.msra.gmra.mrb[0].mxu0 %v47_v26 }
 0x11c   :  { %v130_v27 = vpop.f32.mrb[0].mxu0 }
 0x11d   :  { %v217_v29 = vpop.f32.mrb[1].mxu0  ;;  %v147_v30 = vadd.f32 %v165_v28, %v130_v27 }
 0x11f   :  { %148 = vst [vmem:[#allocation7] sm:$0xff] %v147_v30 }
 0x120   :  { %305 = shalt.err (!%p302_p6)
}
 0x121   :  { %s306_s16 = scalar_lea.hbm %s399_s3, 128 }
 0x122   :  { %p307_p7 = scmp.ne.s32.totalorder %s399_s3, %s306_s16  ;;  %p310_p8 = scmp.lt.u32.totalorder %s306_s16, %s399_s3 }
 0x124   :  { %p312_p9 = pnand %p310_p8, %p307_p7 }
 0x126   :  { %315 = shalt.err (!%p312_p9)
}
 0x127   :  { %158 = dma.vmem_to_hbm [thread:$0]  %s156_s12, 128, %s399_s3, [#allocation4]  }
 0x128   :  { %320 = dma.done.wait [#allocation4], 128  }
 0x129   :  { %321 = vsyncadd [#allocation4], 4294967168 }
 0x12a   :  { %162 = vsyncpa [#allocation3], 1 }
 0x12b   :  { %163 = vsyncpa [#allocation6], 1 }
 0x12c   :  { %164 = vsyncpa [#allocation4], 1 }

</bundles_post_ra>
